<compile_context>
chip_gen: v7x
topology: tpu7x:2x2x1
jax: 0.10.0
libtpu: 0.0.40
codegen_flags: <defaults>
</compile_context>

<pallas_src>
import math

import jax
import jax.numpy as jnp
from jax.experimental import pallas as pl
from jax.experimental.pallas import tpu as pltpu


def _round_up(x, m):
    return ((x + m - 1) // m) * m


def _pick_tile(n_pad, target, quantum):
    """Largest multiple of `quantum` that divides n_pad and is <= target."""
    best = quantum
    t = quantum
    limit = min(target, n_pad)
    while t <= limit:
        if n_pad % t == 0:
            best = t
        t += quantum
    return best


# ----------------------------------------------------------------------------
# Kernel 1: support = x @ W   (tiny GEMM, done once per node tile)
# ----------------------------------------------------------------------------
def _support_kernel(x_ref, w_ref, o_ref):
    # x_ref: (1, TM, F_in)   w_ref: (F_in, F_out_pad)   o_ref: (1, TM, F_out_pad)
    o_ref[0] = jnp.dot(
        x_ref[0], w_ref[...], preferred_element_type=jnp.float32
    ).astype(o_ref.dtype)


# ----------------------------------------------------------------------------
# Kernel 2: out = adj @ support (+ bias), tiled over nodes with f32 accumulator
# ----------------------------------------------------------------------------
def _adj_matmul_kernel_nobias(adj_ref, sup_ref, o_ref, acc_ref):
    # adj_ref: (1, TM, TK)   sup_ref: (1, TK, F_out_pad)
    # o_ref:   (1, TM, F_out_pad)   acc_ref: (TM, F_out_pad) f32
    k = pl.program_id(2)

    @pl.when(k == 0)
    def _():
        acc_ref[...] = jnp.zeros_like(acc_ref)

    acc_ref[...] += jnp.dot(
        adj_ref[0], sup_ref[0], preferred_element_type=jnp.float32
    )

    @pl.when(k == pl.num_programs(2) - 1)
    def _():
        o_ref[0] = acc_ref[...].astype(o_ref.dtype)


def _adj_matmul_kernel_bias(adj_ref, sup_ref, b_ref, o_ref, acc_ref):
    k = pl.program_id(2)

    @pl.when(k == 0)
    def _():
        acc_ref[...] = jnp.zeros_like(acc_ref)

    acc_ref[...] += jnp.dot(
        adj_ref[0], sup_ref[0], preferred_element_type=jnp.float32
    )

    @pl.when(k == pl.num_programs(2) - 1)
    def _():
        o_ref[0] = (acc_ref[...] + b_ref[0].astype(jnp.float32)).astype(o_ref.dtype)


# ----------------------------------------------------------------------------
# Wrapper
# ----------------------------------------------------------------------------
def graph_convolution(x, adj, weight, bias=None, *, tm=256, tk=512, use_bf16=True):
    """Pallas GCN layer: adj @ (x @ weight) (+ bias)."""
    B, N, F_in = x.shape
    F_in_w, F_out = weight.shape
    assert F_in == F_in_w
    assert adj.shape == (B, N, N)
    if bias is not None:
        assert bias.shape == (1, 1, F_out)

    out_dtype = x.dtype
    compute_dtype = jnp.bfloat16 if use_bf16 else jnp.float32
    cbytes = jnp.dtype(compute_dtype).itemsize

    # ---- minimal padding: N -> multiple of 128; tiles divide n_pad ----------
    n_pad = _round_up(N, 128)
    tm = _pick_tile(n_pad, tm, 8)      # row tile (sublane dim): multiple of 8
    tk = _pick_tile(n_pad, tk, 128)    # reduction tile (lane dim of adj): mult of 128
    f_out_pad = _round_up(F_out, 128)  # lane-dense output stores

    # ---- pad + cast inputs (zero padding contributes nothing) --------------
    x_p = jnp.pad(x, ((0, 0), (0, n_pad - N), (0, 0))).astype(compute_dtype)
    w_p = jnp.pad(weight, ((0, 0), (0, f_out_pad - F_out))).astype(compute_dtype)
    adj_p = jnp.pad(adj, ((0, 0), (0, n_pad - N), (0, n_pad - N))).astype(compute_dtype)

    # ---- kernel 1: support = x @ W  (computed once, reused across row tiles)
    support_p = pl.pallas_call(
        _support_kernel,
        out_shape=jax.ShapeDtypeStruct((B, n_pad, f_out_pad), compute_dtype),
        grid_spec=pltpu.PrefetchScalarGridSpec(
            num_scalar_prefetch=0,
            grid=(B, n_pad // tm),
            in_specs=[
                pl.BlockSpec((1, tm, F_in), lambda b, i: (b, i, 0)),
                pl.BlockSpec((F_in, f_out_pad), lambda b, i: (0, 0)),
            ],
            out_specs=pl.BlockSpec((1, tm, f_out_pad), lambda b, i: (b, i, 0)),
        ),
        compiler_params=pltpu.CompilerParams(
            dimension_semantics=("parallel", "parallel")),
    )(x_p, w_p)

    # ---- kernel 2: out = adj @ support (+ bias) -----------------------------
    kernel = _adj_matmul_kernel_nobias
    args = [adj_p, support_p]
    in_specs = [
        pl.BlockSpec((1, tm, tk), lambda b, i, k: (b, i, k)),
        pl.BlockSpec((1, tk, f_out_pad), lambda b, i, k: (b, k, 0)),
    ]
    if bias is not None:
        bias_p = jnp.pad(
            bias, ((0, 0), (0, 0), (0, f_out_pad - F_out))
        ).astype(jnp.float32)
        in_specs.append(pl.BlockSpec((1, 1, f_out_pad), lambda b, i, k: (0, 0, 0)))
        args.append(bias_p)
        kernel = _adj_matmul_kernel_bias

    cost = pl.CostEstimate(
        flops=2 * B * n_pad * n_pad * f_out_pad + 2 * B * n_pad * F_in * f_out_pad,
        transcendentals=0,
        bytes_accessed=(
            B * n_pad * n_pad * cbytes                               # adj stream
            + B * (n_pad // tm) * n_pad * f_out_pad * cbytes         # support re-reads
            + B * n_pad * f_out_pad * jnp.dtype(out_dtype).itemsize  # output
        ),
    )

    # VMEM per step (tm=256, tk=512, f_out_pad=128, bf16):
    #   2*(256*512*2) + 2*(512*128*2) + 2*(256*128*4) + 256*128*4  ~= 1.3 MiB
    # -> well under the default scoped VMEM on all generations (v5e/v6e/v7x).
    out_p = pl.pallas_call(
        kernel,
        out_shape=jax.ShapeDtypeStruct((B, n_pad, f_out_pad), out_dtype),
        grid_spec=pltpu.PrefetchScalarGridSpec(
            num_scalar_prefetch=0,
            grid=(B, n_pad // tm, n_pad // tk),
            in_specs=in_specs,
            out_specs=pl.BlockSpec((1, tm, f_out_pad), lambda b, i, k: (b, i, 0)),
            scratch_shapes=[pltpu.VMEM((tm, f_out_pad), jnp.float32)],
        ),
        compiler_params=pltpu.CompilerParams(
            dimension_semantics=("parallel", "parallel", "arbitrary")),
        cost_estimate=cost,
    )(*args)

    return out_p[:, :N, :F_out]


def init_params(key, in_features, out_features, use_bias):
    """Deterministic init matching reset_parameters: U(-stdv, stdv), stdv=1/sqrt(F_out)."""
    stdv = 1.0 / math.sqrt(out_features)
    kw, kb = jax.random.split(key)
    weight = jax.random.uniform(
        kw, (in_features, out_features), minval=-stdv, maxval=stdv, dtype=jnp.float32)
    bias = None
    if use_bias:
        bias = jax.random.uniform(
            kb, (1, 1, out_features), minval=-stdv, maxval=stdv, dtype=jnp.float32)
    return weight, bias


if __name__ == "__main__":
    key = jax.random.PRNGKey(0)
    k_x, k_adj, k_param = jax.random.split(key, 3)

    B, N, F_in, F_out = 2, 16, 8, 32

    x = jax.random.normal(k_x, (B, N, F_in), dtype=jnp.float32)
    adj = jax.random.uniform(k_adj, (B, N, N), dtype=jnp.float32)
    weight, bias = init_params(k_param, F_in, F_out, use_bias=True)

    gcn = jax.jit(graph_convolution, static_argnames=("tm", "tk", "use_bf16"))

    out_bias = gcn(x, adj, weight, bias)
    out_nobias = gcn(x, adj, weight, None)
    jax.block_until_ready((out_bias, out_nobias))

    # plain-JAX f32 reference (kernel uses bf16 inputs w/ f32 accumulation,
    # so compare with a bf16-appropriate tolerance)
    ref = jnp.matmul(adj, jnp.matmul(x, weight))
    assert out_bias.shape == (B, N, F_out)
    assert out_nobias.shape == (B, N, F_out)
    assert jnp.allclose(out_nobias, ref, atol=5e-2, rtol=5e-2)
    assert jnp.allclose(out_bias, ref + bias, atol=5e-2, rtol=5e-2)

    print("KERNEL_OK")
</pallas_src>

<mosaic_0001>
module attributes {stable_mosaic.version = 11 : i64} {
  func.func @_support_kernel(%arg0: i32, %arg1: i32, %arg2: memref<1x128x8xbf16, #tpu.memory_space<vmem>>, %arg3: memref<8x128xbf16, #tpu.memory_space<vmem>>, %arg4: memref<1x128x128xbf16, #tpu.memory_space<vmem>>) attributes {dimension_semantics = [#tpu.dimension_semantics<parallel>, #tpu.dimension_semantics<parallel>], iteration_bounds = array<i64: 2, 1>, scalar_prefetch = 0 : i64, scratch_operands = 0 : i64, tpu.core_type = #tpu.core_type<tc>, window_params = [{transform_indices = @transform_0, window_bounds = array<i64: 1, 128, 8>}, {pipeline_mode = #tpu.pipeline_mode<synchronous>, transform_indices = @transform_1, window_bounds = array<i64: 8, 128>}, {transform_indices = @transform_2, window_bounds = array<i64: 1, 128, 128>}]} {
    %c0 = arith.constant 0 : index
    %c0_0 = arith.constant 0 : index
    %c0_1 = arith.constant 0 : index
    %0 = vector.load %arg2[%c0, %c0_0, %c0_1] : memref<1x128x8xbf16, #tpu.memory_space<vmem>>, vector<1x128x8xbf16>
    %1 = vector.shape_cast %0 : vector<1x128x8xbf16> to vector<128x8xbf16>
    %c0_2 = arith.constant 0 : index
    %c0_3 = arith.constant 0 : index
    %2 = vector.load %arg3[%c0_2, %c0_3] : memref<8x128xbf16, #tpu.memory_space<vmem>>, vector<8x128xbf16>
    %cst = arith.constant dense<0.000000e+00> : vector<128x128xf32>
    %3 = tpu.matmul %1, %2, %cst {dimension_numbers = #tpu.dot_dimension_numbers<[1], [0], [0], [1], [0, 0, 1, 1], [], []>} : vector<128x8xbf16>, vector<8x128xbf16>, vector<128x128xf32> -> vector<128x128xf32>
    %4 = arith.truncf %3 : vector<128x128xf32> to vector<128x128xbf16>
    %c0_4 = arith.constant 0 : index
    %c0_5 = arith.constant 0 : index
    %c0_6 = arith.constant 0 : index
    %5 = vector.load %arg4[%c0_4, %c0_5, %c0_6] : memref<1x128x128xbf16, #tpu.memory_space<vmem>>, vector<1x128x128xbf16>
    %6 = vector.shape_cast %5 : vector<1x128x128xbf16> to vector<128x128xbf16>
    %7 = vector.shape_cast %4 : vector<128x128xbf16> to vector<1x128x128xbf16>
    tpu.vector_store %arg4[%c0_4, %c0_5, %c0_6], %7 {strides = array<i32>} : memref<1x128x128xbf16, #tpu.memory_space<vmem>>, vector<1x128x128xbf16>,
    return
  }
  func.func @transform_0(%arg0: i32, %arg1: i32) -> (i32, i32, i32) {
    %c0_i32 = arith.constant 0 : i32
    %c0_i32_0 = arith.constant 0 : i32
    return %arg0, %arg1, %c0_i32 : i32, i32, i32
  }
  func.func @transform_1(%arg0: i32, %arg1: i32) -> (i32, i32) {
    %c0_i32 = arith.constant 0 : i32
    %c0_i32_0 = arith.constant 0 : i32
    %c0_i32_1 = arith.constant 0 : i32
    return %c0_i32, %c0_i32_0 : i32, i32
  }
  func.func @transform_2(%arg0: i32, %arg1: i32) -> (i32, i32, i32) {
    %c0_i32 = arith.constant 0 : i32
    %c0_i32_0 = arith.constant 0 : i32
    return %arg0, %arg1, %c0_i32 : i32, i32, i32
  }
}

module attributes {stable_mosaic.version = 11 : i64} {
  func.func @_adj_matmul_kernel_bias(%arg0: i32, %arg1: i32, %arg2: i32, %arg3: memref<1x128x128xbf16, #tpu.memory_space<vmem>>, %arg4: memref<1x128x128xbf16, #tpu.memory_space<vmem>>, %arg5: memref<1x1x128xf32, #tpu.memory_space<vmem>>, %arg6: memref<1x128x128xf32, #tpu.memory_space<vmem>>, %arg7: memref<128x128xf32, #tpu.memory_space<vmem>>) attributes {dimension_semantics = [#tpu.dimension_semantics<parallel>, #tpu.dimension_semantics<parallel>, #tpu.dimension_semantics<arbitrary>], iteration_bounds = array<i64: 2, 1, 1>, scalar_prefetch = 0 : i64, scratch_operands = 1 : i64, tpu.core_type = #tpu.core_type<tc>, window_params = [{transform_indices = @transform_0, window_bounds = array<i64: 1, 128, 128>}, {transform_indices = @transform_1, window_bounds = array<i64: 1, 128, 128>}, {pipeline_mode = #tpu.pipeline_mode<synchronous>, transform_indices = @transform_2, window_bounds = array<i64: 1, 1, 128>}, {transform_indices = @transform_3, window_bounds = array<i64: 1, 128, 128>}]} {
    %c0_i32 = arith.constant 0 : i32
    %0 = arith.cmpi eq, %arg2, %c0_i32 : i32
    %1 = arith.extui %0 : i1 to i32
    %c0_i32_0 = arith.constant 0 : i32
    %2 = arith.cmpi ne, %1, %c0_i32_0 : i32
    scf.if %2 {
      %cst_12 = arith.constant 0.000000e+00 : f32
      %14 = vector.broadcast %cst_12 : f32 to vector<128x128xf32>
      %c0_13 = arith.constant 0 : index
      %c0_14 = arith.constant 0 : index
      %15 = vector.load %arg7[%c0_13, %c0_14] : memref<128x128xf32, #tpu.memory_space<vmem>>, vector<128x128xf32>
      tpu.vector_store %arg7[%c0_13, %c0_14], %14 {strides = array<i32>} : memref<128x128xf32, #tpu.memory_space<vmem>>, vector<128x128xf32>,
    } else {
    }
    %c0 = arith.constant 0 : index
    %c0_1 = arith.constant 0 : index
    %3 = vector.load %arg7[%c0, %c0_1] : memref<128x128xf32, #tpu.memory_space<vmem>>, vector<128x128xf32>
    %c0_2 = arith.constant 0 : index
    %c0_3 = arith.constant 0 : index
    %c0_4 = arith.constant 0 : index
    %4 = vector.load %arg3[%c0_2, %c0_3, %c0_4] : memref<1x128x128xbf16, #tpu.memory_space<vmem>>, vector<1x128x128xbf16>
    %5 = vector.shape_cast %4 : vector<1x128x128xbf16> to vector<128x128xbf16>
    %c0_5 = arith.constant 0 : index
    %c0_6 = arith.constant 0 : index
    %c0_7 = arith.constant 0 : index
    %6 = vector.load %arg4[%c0_5, %c0_6, %c0_7] : memref<1x128x128xbf16, #tpu.memory_space<vmem>>, vector<1x128x128xbf16>
    %7 = vector.shape_cast %6 : vector<1x128x128xbf16> to vector<128x128xbf16>
    %cst = arith.constant dense<0.000000e+00> : vector<128x128xf32>
    %8 = tpu.matmul %5, %7, %cst {dimension_numbers = #tpu.dot_dimension_numbers<[1], [0], [0], [1], [0, 0, 1, 1], [], []>} : vector<128x128xbf16>, vector<128x128xbf16>, vector<128x128xf32> -> vector<128x128xf32>
    %9 = arith.addf %3, %8 : vector<128x128xf32>
    %c0_8 = arith.constant 0 : index
    %c0_9 = arith.constant 0 : index
    %10 = vector.load %arg7[%c0_8, %c0_9] : memref<128x128xf32, #tpu.memory_space<vmem>>, vector<128x128xf32>
    tpu.vector_store %arg7[%c0_8, %c0_9], %9 {strides = array<i32>} : memref<128x128xf32, #tpu.memory_space<vmem>>, vector<128x128xf32>,
    %c0_i32_10 = arith.constant 0 : i32
    %11 = arith.cmpi eq, %arg2, %c0_i32_10 : i32
    %12 = arith.extui %11 : i1 to i32
    %c0_i32_11 = arith.constant 0 : i32
    %13 = arith.cmpi ne, %12, %c0_i32_11 : i32
    scf.if %13 {
      %c0_12 = arith.constant 0 : index
      %c0_13 = arith.constant 0 : index
      %14 = vector.load %arg7[%c0_12, %c0_13] : memref<128x128xf32, #tpu.memory_space<vmem>>, vector<128x128xf32>
      %c0_14 = arith.constant 0 : index
      %c0_15 = arith.constant 0 : index
      %c0_16 = arith.constant 0 : index
      %15 = vector.load %arg5[%c0_14, %c0_15, %c0_16] : memref<1x1x128xf32, #tpu.memory_space<vmem>>, vector<1x1x128xf32>
      %16 = vector.shape_cast %15 : vector<1x1x128xf32> to vector<1x128xf32>
      %17 = vector.broadcast %16 : vector<1x128xf32> to vector<128x128xf32>
      %18 = arith.addf %14, %17 : vector<128x128xf32>
      %c0_17 = arith.constant 0 : index
      %c0_18 = arith.constant 0 : index
      %c0_19 = arith.constant 0 : index
      %19 = vector.load %arg6[%c0_17, %c0_18, %c0_19] : memref<1x128x128xf32, #tpu.memory_space<vmem>>, vector<1x128x128xf32>
      %20 = vector.shape_cast %19 : vector<1x128x128xf32> to vector<128x128xf32>
      %21 = vector.shape_cast %18 : vector<128x128xf32> to vector<1x128x128xf32>
      tpu.vector_store %arg6[%c0_17, %c0_18, %c0_19], %21 {strides = array<i32>} : memref<1x128x128xf32, #tpu.memory_space<vmem>>, vector<1x128x128xf32>,
    } else {
    }
    return
  }
  func.func @transform_0(%arg0: i32, %arg1: i32, %arg2: i32) -> (i32, i32, i32) {
    %c0_i32 = arith.constant 0 : i32
    return %arg0, %arg1, %arg2 : i32, i32, i32
  }
  func.func @transform_1(%arg0: i32, %arg1: i32, %arg2: i32) -> (i32, i32, i32) {
    %c0_i32 = arith.constant 0 : i32
    %c0_i32_0 = arith.constant 0 : i32
    return %arg0, %arg2, %c0_i32 : i32, i32, i32
  }
  func.func @transform_2(%arg0: i32, %arg1: i32, %arg2: i32) -> (i32, i32, i32) {
    %c0_i32 = arith.constant 0 : i32
    %c0_i32_0 = arith.constant 0 : i32
    %c0_i32_1 = arith.constant 0 : i32
    %c0_i32_2 = arith.constant 0 : i32
    return %c0_i32, %c0_i32_0, %c0_i32_1 : i32, i32, i32
  }
  func.func @transform_3(%arg0: i32, %arg1: i32, %arg2: i32) -> (i32, i32, i32) {
    %c0_i32 = arith.constant 0 : i32
    %c0_i32_0 = arith.constant 0 : i32
    return %arg0, %arg1, %c0_i32 : i32, i32, i32
  }
}

</mosaic_0001>

<bundles_post_ra>
// kernel: graph_convolution.3
= control target key start
LH: loop header
LB: loop body
LE: loop exit
PB: predicated region body
PF: predicated region fallthrough
CT: control target
= control target key end

     0   :  { %s908_s12 = smov 0   ;;  %s910_s13 = smov 0   ;;  %s989_s0 = inlined_call_operand.vmem [shape: bf16[2,128,128], index: 0, kind: input, shape index: {}]   ;;  %s990_s1 = inlined_call_operand.vmem [shape: bf16[2,128,128], index: 1, kind: input, shape index: {}]   ;;  %s991_s2 = inlined_call_operand.vmem [shape: f32[1,1,128], index: 2, kind: input, shape index: {}]   ;;  %s992_s3 = inlined_call_operand.vmem [shape: f32[2,128,128], index: 3, kind: output, shape index: {}]  }
   0x1   :  { %s912_s14 = smov 0  }
   0x2 LB: > { %s32_s15 = sadd.s32 1, %s882_s13  ;;  %p731_p0 = scmp.ge.s32.totalorder %s886_s14, 1  ;;  %s886_s14 = sphi %s912_s14, %s13_s14   ;;  %s882_s13 = sphi %s910_s13, %s994_s13   ;;  %s878_s12 = sphi %s908_s12, %s993_s12  }
   0x3   : > { %p34_p1 = scmp.ge.s32.totalorder %s32_s15, 2  ;;  %p187_p2 = scmp.lt.s32.totalorder %s886_s14, 3 }
   0x5   : > { %s996_s15 = smov (%p34_p1, %s32_s15), 0  ;;  %p188_p3 = pnand %p731_p0, %p187_p2 }
   0x6   : > { %p232_p4 = scmp.lt.s32.totalorder (!%p188_p3), %s878_s12, 1  ;;  %v754_v16 = vld [vmem:[%s991_s2] ss:$0 sm:$0xff] (!%p188_p3) }
   0x7   : > { %191 = sbr.rel (%p188_p3) target bundleno = 276 (0x114), region = 32 }
   0xe   : > { %s998_s12 = smov (!%p232_p4, %s878_s12), 1 }
   0xf   : > { %s757_s16 = sshll.u32 %s998_s12, 6  ;;  %s759_s23 = sshll.u32 %s998_s12, 7 }
  0x10   : > { %s932_s19 = scalar_lea.vmem %s990_s1, %s757_s16  ;;  %s940_s22 = scalar_lea.vmem %s989_s0, %s757_s16 }
  0x11   : > { %v848_v0 = vld [vmem:[%s932_s19] sm:$0xff]   ;;  %v849_v1 = vld [vmem:[%s932_s19 + $0x8] sm:$0xff]   ;;  %v850_v2 = vld [vmem:[%s932_s19 + $0x10] sm:$0xff]   ;;  %s962_s28 = scalar_lea.vmem %s992_s3, %s759_s23 }
  0x12   : > { %776 = vmatprep.subr.bf16.mxu0 %v848_v0  ;;  %808 = vmatprep.subr.bf16.mxu1 %v848_v0  ;;  %v851_v3 = vld [vmem:[%s932_s19 + $0x18] sm:$0xff]   ;;  %v856_v4 = vld [vmem:[%s940_s22] sm:$0xff]   ;;  %v853_v7 = vld [vmem:[%s932_s19 + $0x28] sm:$0xff]  }
  0x13   : > { %777 = vmatpush3.bf16.msra.mxu0 %v848_v0  ;;  %816 = vmatpush3.bf16.msra.mxu1 %v848_v0  ;;  %v857_v5 = vld [vmem:[%s940_s22 + $0x20] sm:$0xff]   ;;  %v854_v8 = vld [vmem:[%s932_s19 + $0x30] sm:$0xff]   ;;  %v855_v9 = vld [vmem:[%s932_s19 + $0x38] sm:$0xff]  }
  0x14   : > { %778 = vmatprep.subr.bf16.mxu0 %v849_v1  ;;  %809 = vmatprep.subr.bf16.mxu1 %v849_v1  ;;  %v852_v6 = vld [vmem:[%s932_s19 + $0x20] sm:$0xff]   ;;  %v858_v10 = vld [vmem:[%s940_s22 + $0x8] sm:$0xff]   ;;  %v860_v12 = vld [vmem:[%s940_s22 + $0x10] sm:$0xff]  }
  0x15   : > { %792 = vmatprep.mubr.bf16.mxu0 %v856_v4  ;;  %800 = vmatprep.mubr.bf16.mxu1 %v857_v5  ;;  %v859_v11 = vld [vmem:[%s940_s22 + $0x28] sm:$0xff]   ;;  %v861_v13 = vld [vmem:[%s940_s22 + $0x30] sm:$0xff]   ;;  %v862_v14 = vld [vmem:[%s940_s22 + $0x18] sm:$0xff]  }
  0x16   : > { %v863_v15 = vld [vmem:[%s940_s22 + $0x38] sm:$0xff]  }
  0x17   : > { %779 = vmatpush3.bf16.msra.mxu0 %v849_v1  ;;  %817 = vmatpush3.bf16.msra.mxu1 %v849_v1 }
  0x18   : > { %780 = vmatprep.subr.bf16.mxu0 %v850_v2  ;;  %810 = vmatprep.subr.bf16.mxu1 %v850_v2 }
  0x1b   : > { %781 = vmatpush3.bf16.msra.mxu0 %v850_v2  ;;  %818 = vmatpush3.bf16.msra.mxu1 %v850_v2 }
  0x1c   : > { %782 = vmatprep.subr.bf16.mxu0 %v851_v3  ;;  %811 = vmatprep.subr.bf16.mxu1 %v851_v3 }
  0x1f   : > { %783 = vmatpush3.bf16.msra.mxu0 %v851_v3  ;;  %819 = vmatpush3.bf16.msra.mxu1 %v851_v3 }
  0x20   : > { %784 = vmatprep.subr.bf16.mxu0 %v852_v6  ;;  %812 = vmatprep.subr.bf16.mxu1 %v852_v6 }
  0x23   : > { %785 = vmatpush3.bf16.msra.mxu0 %v852_v6  ;;  %820 = vmatpush3.bf16.msra.mxu1 %v852_v6 }
  0x24   : > { %786 = vmatprep.subr.bf16.mxu0 %v853_v7  ;;  %813 = vmatprep.subr.bf16.mxu1 %v853_v7 }
  0x27   : > { %787 = vmatpush3.bf16.msra.mxu0 %v853_v7  ;;  %821 = vmatpush3.bf16.msra.mxu1 %v853_v7 }
  0x28   : > { %788 = vmatprep.subr.bf16.mxu0 %v854_v8  ;;  %814 = vmatprep.subr.bf16.mxu1 %v854_v8 }
  0x2b   : > { %789 = vmatpush3.bf16.msra.mxu0 %v854_v8  ;;  %822 = vmatpush3.bf16.msra.mxu1 %v854_v8 }
  0x2c   : > { %790 = vmatprep.subr.bf16.mxu0 %v855_v9  ;;  %815 = vmatprep.subr.bf16.mxu1 %v855_v9 }
  0x2f   : > { %791 = vmatpush3.bf16.msra.mxu0 %v855_v9  ;;  %823 = vmatpush3.bf16.msra.mxu1 %v855_v9 }
  0x32   : > { %793 = vmatmul.mubr.bf16.vlgmr.msra.gmra.mrb[0].mxu0 %v858_v10  ;;  %801 = vmatmul.mubr.bf16.vlgmr.msra.gmra.mrb[0].mxu1 %v859_v11 }
  0x33   : > { %796 = vmatprep.mubr.bf16.mxu0 %v860_v12  ;;  %804 = vmatprep.mubr.bf16.mxu1 %v861_v13 }
  0x3a   : > { %797 = vmatmul.mubr.bf16.gmra.mrb[4].mxu0 %v862_v14  ;;  %805 = vmatmul.mubr.bf16.gmra.mrb[4].mxu1 %v863_v15 }
 0x105   : > { %v794_v17 = vpop.f32.mrb[0].mxu0  ;;  %v802_v18 = vpop.f32.mrb[0].mxu1 }
 0x106   : > { %v586_v19 = vadd.f32 %v794_v17, %v754_v16  ;;  %v594_v20 = vadd.f32 %v802_v18, %v754_v16  ;;  %v463_v21 = vpop.f32.mrb[1].mxu0  ;;  %v495_v22 = vpop.f32.mrb[1].mxu1 }
 0x107   : > { %v584_v23 = vadd.f32 %v754_v16, %v463_v21  ;;  %v592_v24 = vadd.f32 %v754_v16, %v495_v22  ;;  %v795_v25 = vpop.f32.mrb[2].mxu0  ;;  %v803_v26 = vpop.f32.mrb[2].mxu1 }
 0x108   : > { %602 = vst [vmem:[%s962_s28 + $0x10] sm:$0xff] %v586_v19  ;;  %610 = vst [vmem:[%s962_s28 + $0x50] sm:$0xff] %v594_v20  ;;  %v587_v27 = vadd.f32 %v795_v25, %v754_v16  ;;  %v595_v28 = vadd.f32 %v803_v26, %v754_v16  ;;  %v466_v29 = vpop.f32.mrb[3].mxu0  ;;  %v498_v30 = vpop.f32.mrb[3].mxu1 }
 0x109   : > { %600 = vst [vmem:[%s962_s28] sm:$0xff] %v584_v23  ;;  %608 = vst [vmem:[%s962_s28 + $0x40] sm:$0xff] %v592_v24  ;;  %v585_v31 = vadd.f32 %v754_v16, %v466_v29  ;;  %v593_v32 = vadd.f32 %v754_v16, %v498_v30 }
 0x10a   : > { %603 = vst [vmem:[%s962_s28 + $0x18] sm:$0xff] %v587_v27  ;;  %611 = vst [vmem:[%s962_s28 + $0x58] sm:$0xff] %v595_v28 }
 0x10b   : > { %601 = vst [vmem:[%s962_s28 + $0x8] sm:$0xff] %v585_v31  ;;  %609 = vst [vmem:[%s962_s28 + $0x48] sm:$0xff] %v593_v32 }
 0x10d   : > { %v798_v33 = vpop.f32.mrb[4].mxu0  ;;  %v806_v34 = vpop.f32.mrb[4].mxu1 }
 0x10e   : > { %v590_v35 = vadd.f32 %v798_v33, %v754_v16  ;;  %v598_v36 = vadd.f32 %v806_v34, %v754_v16  ;;  %v479_v37 = vpop.f32.mrb[5].mxu0  ;;  %v511_v38 = vpop.f32.mrb[5].mxu1 }
 0x10f   : > { %v588_v39 = vadd.f32 %v754_v16, %v479_v37  ;;  %v596_v40 = vadd.f32 %v754_v16, %v511_v38  ;;  %v799_v41 = vpop.f32.mrb[6].mxu0  ;;  %v807_v42 = vpop.f32.mrb[6].mxu1 }
 0x110   : > { %606 = vst [vmem:[%s962_s28 + $0x30] sm:$0xff] %v590_v35  ;;  %614 = vst [vmem:[%s962_s28 + $0x70] sm:$0xff] %v598_v36  ;;  %v591_v43 = vadd.f32 %v799_v41, %v754_v16  ;;  %v599_v44 = vadd.f32 %v807_v42, %v754_v16  ;;  %v482_v45 = vpop.f32.mrb[7].mxu0  ;;  %v514_v46 = vpop.f32.mrb[7].mxu1 }
 0x111   : > { %604 = vst [vmem:[%s962_s28 + $0x20] sm:$0xff] %v588_v39  ;;  %612 = vst [vmem:[%s962_s28 + $0x60] sm:$0xff] %v596_v40  ;;  %v589_v47 = vadd.f32 %v754_v16, %v482_v45  ;;  %v597_v48 = vadd.f32 %v754_v16, %v514_v46 }
 0x112   : > { %607 = vst [vmem:[%s962_s28 + $0x38] sm:$0xff] %v591_v43  ;;  %615 = vst [vmem:[%s962_s28 + $0x78] sm:$0xff] %v599_v44 }
 0x113   : > { %605 = vst [vmem:[%s962_s28 + $0x28] sm:$0xff] %v589_v47  ;;  %613 = vst [vmem:[%s962_s28 + $0x68] sm:$0xff] %v597_v48 }
 0x114 PF: > { %s13_s14 = sadd.s32 1, %s886_s14   ;;  %s993_s12 = smov %s882_s13 }
 0x115   : > { %p10_p5 = scmp.ge.s32.totalorder %s13_s14, 4   ;;  %s994_s13 = smov %s996_s15 }
 0x117   :  { %12 = sbr.rel (!%p10_p5) target bundleno = 2 (0x2), region = 73 }

// kernel: graph_convolution.2
= control target key start
LH: loop header
LB: loop body
LE: loop exit
PB: predicated region body
PF: predicated region fallthrough
CT: control target
= control target key end

     0   :  { %s744_s9 = smov 0   ;;  %s746_s10 = smov 0   ;;  %s788_s0 = inlined_call_operand.vmem [shape: bf16[2,128,8], index: 0, kind: input, shape index: {}]   ;;  %s789_s1 = inlined_call_operand.vmem [shape: bf16[8,128], index: 1, kind: input, shape index: {}]   ;;  %s790_s2 = inlined_call_operand.vmem [shape: bf16[2,128,128], index: 2, kind: output, shape index: {}]  }
   0x1   :  { %s748_s11 = smov 0  }
   0x2 LB: > { %s24_s12 = sadd.s32 1, %s723_s10  ;;  %p538_p0 = scmp.ge.s32.totalorder %s727_s11, 1  ;;  %s727_s11 = sphi %s748_s11, %s12_s11   ;;  %s723_s10 = sphi %s746_s10, %s792_s10   ;;  %s719_s9 = sphi %s744_s9, %s791_s9  }
   0x3   : > { %p26_p1 = scmp.ge.s32.totalorder %s24_s12, 2  ;;  %p133_p2 = scmp.lt.s32.totalorder %s727_s11, 3 }
   0x5   : > { %s794_s12 = smov (%p26_p1, %s24_s12), 0  ;;  %p134_p3 = pnand %p538_p0, %p133_p2 }
   0x6   : > { %v200_v0 = vld [vmem:[%s789_s1] sm:$0xf] (!%p134_p3)  ;;  %vm266_vm0 = vcmask (!%p134_p3), 1043456   ;;  %p164_p4 = scmp.lt.s32.totalorder (!%p134_p3), %s719_s9, 1  ;;  %vm241_vm1 = vcmask (!%p134_p3), 64512  }
   0x7   : > { %137 = sbr.rel (%p134_p3) target bundleno = 246 (0xf6), region = 28  ;;  %671 = vmatprep.subr.msk.bf16.mxu0 (!%p134_p3), %vm266_vm0, %v200_v0  ;;  %672 = vmatprep.subr.msk.bf16.mxu1 (!%p134_p3), %vm266_vm0, %v200_v0  ;;  %v268_v1 = vsel (!%p134_p3), %vm266_vm0, %v200_v0, 0 }
   0x8   : > { %652 = vmatpush3.bf16.msra.mxu0 (!%p134_p3), %v268_v1  ;;  %670 = vmatpush3.bf16.msra.mxu1 (!%p134_p3), %v268_v1 }
   0xe   : > { %s796_s9 = smov (!%p164_p4, %s719_s9), 1 }
   0xf   : > { %s577_s15 = sshll.u32 %s796_s9, 6 }
  0x10   : > { %s171_s18 = scalar_lea.vmem %s788_s0, %s577_s15  ;;  %s181_s21 = scalar_lea.vmem %s790_s2, %s577_s15 }
  0x11   : > { %v697_v2 = vld [vmem:[%s171_s18] sm:$0xff]   ;;  %v699_v4 = vld [vmem:[%s171_s18 + $0x8] sm:$0xff]   ;;  %v701_v6 = vld [vmem:[%s171_s18 + $0x10] sm:$0xff]  }
  0x12   : > { %v698_v3 = vld [vmem:[%s171_s18 + $0x20] sm:$0xff]   ;;  %653 = vmatprep.mubr.msk.bf16.mxu0 %vm241_vm1, %v697_v2  ;;  %v700_v5 = vld [vmem:[%s171_s18 + $0x28] sm:$0xff]   ;;  %v702_v7 = vld [vmem:[%s171_s18 + $0x30] sm:$0xff]  }
  0x13   : > { %661 = vmatprep.mubr.msk.bf16.mxu1 %vm241_vm1, %v698_v3  ;;  %654 = vmatmul.mubr.msk.bf16.vlgmr.msra.gmra.mrb[0].mxu0 %vm241_vm1, %v699_v4  ;;  %v703_v8 = vld [vmem:[%s171_s18 + $0x18] sm:$0xff]  }
  0x14   : > { %662 = vmatmul.mubr.msk.bf16.vlgmr.msra.gmra.mrb[0].mxu1 %vm241_vm1, %v700_v5  ;;  %657 = vmatprep.mubr.msk.bf16.mxu0 %vm241_vm1, %v701_v6  ;;  %v704_v9 = vld [vmem:[%s171_s18 + $0x38] sm:$0xff]  }
  0x15   : > { %665 = vmatprep.mubr.msk.bf16.mxu1 %vm241_vm1, %v702_v7 }
  0x1b   : > { %658 = vmatmul.mubr.msk.bf16.gmra.mrb[4].mxu0 %vm241_vm1, %v703_v8 }
  0x1c   : > { %666 = vmatmul.mubr.msk.bf16.gmra.mrb[4].mxu1 %vm241_vm1, %v704_v9 }
  0xe6   : > { %v655_v10 = vpop.f32.mrb[0].mxu0 }
  0xe7   : > { %v663_v11 = vpop.f32.mrb[0].mxu1  ;;  %v304_v12 = vpop.f32.mrb[1].mxu0 }
  0xe8   : > { %v336_v13 = vpop.f32.mrb[1].mxu1  ;;  %v656_v14 = vpop.f32.mrb[2].mxu0 }
  0xe9   : > { %v603_v15 = vpack.c.bf16 %v656_v14, %v655_v10  ;;  %v664_v16 = vpop.f32.mrb[2].mxu1  ;;  %v307_v17 = vpop.f32.mrb[3].mxu0 }
  0xea   : > { %v623_v18 = vpack.c.bf16 %v664_v16, %v663_v11  ;;  %v598_v19 = vpack.c.bf16 %v307_v17, %v304_v12  ;;  %v339_v20 = vpop.f32.mrb[3].mxu1 }
  0xeb   : > { %635 = vst [vmem:[%s181_s21 + $0x8] sm:$0xff] %v603_v15   ;;  %v618_v21 = vpack.c.bf16 %v339_v20, %v336_v13 }
  0xec   : > { %639 = vst [vmem:[%s181_s21 + $0x28] sm:$0xff] %v623_v18   ;;  %599 = vst [vmem:[%s181_s21] sm:$0xff] %v598_v19  }
  0xed   : > { %638 = vst [vmem:[%s181_s21 + $0x20] sm:$0xff] %v618_v21  }
  0xee   : > { %v659_v22 = vpop.f32.mrb[4].mxu0 }
  0xef   : > { %v667_v23 = vpop.f32.mrb[4].mxu1  ;;  %v320_v24 = vpop.f32.mrb[5].mxu0 }
  0xf0   : > { %v352_v25 = vpop.f32.mrb[5].mxu1  ;;  %v660_v26 = vpop.f32.mrb[6].mxu0 }
  0xf1   : > { %v613_v27 = vpack.c.bf16 %v660_v26, %v659_v22  ;;  %v668_v28 = vpop.f32.mrb[6].mxu1  ;;  %v323_v29 = vpop.f32.mrb[7].mxu0 }
  0xf2   : > { %v633_v30 = vpack.c.bf16 %v668_v28, %v667_v23  ;;  %v608_v31 = vpack.c.bf16 %v323_v29, %v320_v24  ;;  %v355_v32 = vpop.f32.mrb[7].mxu1 }
  0xf3   : > { %637 = vst [vmem:[%s181_s21 + $0x18] sm:$0xff] %v613_v27   ;;  %v628_v33 = vpack.c.bf16 %v355_v32, %v352_v25 }
  0xf4   : > { %641 = vst [vmem:[%s181_s21 + $0x38] sm:$0xff] %v633_v30   ;;  %636 = vst [vmem:[%s181_s21 + $0x10] sm:$0xff] %v608_v31  }
  0xf5   : > { %640 = vst [vmem:[%s181_s21 + $0x30] sm:$0xff] %v628_v33  }
  0xf6 PF: > { %s12_s11 = sadd.s32 1, %s727_s11   ;;  %s791_s9 = smov %s723_s10 }
  0xf7   : > { %p9_p5 = scmp.ge.s32.totalorder %s12_s11, 4   ;;  %s792_s10 = smov %s794_s12 }
  0xf9   :  { %11 = sbr.rel (!%p9_p5) target bundleno = 2 (0x2), region = 58 }

</bundles_post_ra>
